<compile_context>
chip_gen: v6e
topology: v6e:2x2x1
jax: 0.10.0
libtpu: 0.0.40
codegen_flags: <defaults>
</compile_context>

<pallas_src>
import numpy as np
import jax
import jax.numpy as jnp
from jax.experimental import pallas as pl
from jax.experimental.pallas import tpu as pltpu


# -----------------------------------------------------------------------------
# Pallas kernel: fused HOPE forward for one row block of nodes.
# -----------------------------------------------------------------------------
def hope_kernel(a_ref, xwg_ref, xwf_ref, bg_ref, bf_ref, wog_ref, wof_ref,
                bo_ref, out_ref):
    # Single propagation for all four GCN branches: A row-block @ XW_gcn.
    # (A and XW_gcn may be bf16 in HBM/VMEM; accumulation is f32 on the MXU.)
    prop = jnp.dot(a_ref[...], xwg_ref[...],
                   preferred_element_type=jnp.float32)            # [TM, 4H]
    gcn_h = jnp.maximum(prop + bg_ref[...], 0.0)                  # [TM, 4H]

    # Feature branch (no propagation): relu(precomputed x @ W_feat + b_feat).
    feat_h = jnp.maximum(xwf_ref[...] + bf_ref[...], 0.0)         # [TM, H]

    # Classifier: exact row-split of w_out (split done in the wrapper so both
    # operands here are whole, sublane-aligned refs).
    out_ref[...] = (
        jnp.dot(gcn_h, wog_ref[...], preferred_element_type=jnp.float32)
        + jnp.dot(feat_h, wof_ref[...], preferred_element_type=jnp.float32)
        + bo_ref[...])                                            # [TM, C_pad]


# -----------------------------------------------------------------------------
# VMEM / tile budgeting helpers (generation-aware).
# -----------------------------------------------------------------------------
def _vmem_capacity_bytes():
    try:
        info = pltpu.get_tpu_info()
        return int(getattr(info, "vmem_capacity_bytes", 64 << 20))
    except Exception:
        return 64 << 20   # conservative (v7x-sized) fallback


def _estimate_vmem_bytes(tm, n, h, cp, a_bytes, xw_bytes, resident_bufs):
    """Per-buffer VMEM byte count for the chosen tiling (+20% margin)."""
    h4 = 4 * h
    rb = resident_bufs                       # 1 with Buffered(1), 2 by default
    total = 0
    total += 2 * tm * n * a_bytes            # A row blocks (double-buffered)
    total += rb * n * h4 * xw_bytes          # resident XW_gcn
    total += 2 * tm * h * 4                  # XW_feat row blocks
    total += rb * (h4 + h + cp) * 4          # biases (b_gcn, b_feat, b_out)
    total += rb * (h4 + h) * cp * 4          # classifier weight slabs
    total += 2 * tm * cp * 4                 # output blocks
    total += tm * (2 * h4 + 2 * h + 2 * cp) * 4   # in-body intermediates
    return int(total * 1.2)


def _select_row_tile(n, h, cp, a_bytes, xw_bytes, vmem_cap, requested_tm):
    small_vmem = vmem_cap <= (80 << 20)                  # v7x-class part
    a_budget = (16 << 20) if small_vmem else (48 << 20)  # double-buffered A rows
    ceiling = int(vmem_cap * (0.80 if small_vmem else 0.85))
    if requested_tm is not None:
        tm = int(requested_tm)
    else:
        tm = a_budget // max(2 * n * a_bytes, 1)
        # Keep >= 2 grid steps so the "parallel" row axis can shard across
        # v7x's two TensorCores.
        half = (((n + 1) // 2) + 7) // 8 * 8
        tm = min(tm, max(8, half))
    tm = max(8, (tm // 8) * 8)
    tm = min(tm, n)
    # Shrink the tile until the per-buffer estimate fits the VMEM ceiling.
    while tm > 8 and _estimate_vmem_bytes(tm, n, h, cp, a_bytes, xw_bytes, 2) > ceiling:
        tm = max(8, ((tm // 2) // 8) * 8)
    return tm, ceiling


# -----------------------------------------------------------------------------
# Wrapper: host-side exact layout rewrites + pallas_call.
# -----------------------------------------------------------------------------
def hope_forward(a_norm, struct_x, static_x, x, neighbor_x, params,
                 *, tm=None, use_bf16=False):
    f32 = jnp.float32
    n = x.shape[0]
    h = params["w_feat"].shape[1]
    c = params["w_out"].shape[1]
    h4 = 4 * h
    cp = ((c + 127) // 128) * 128            # lane-dense (padded) class dim

    # ---- grid-invariant precompute (once, in XLA; NOT per grid step) --------
    xw_gcn = jnp.concatenate([
        struct_x.astype(f32) @ params["w_struct"],
        static_x.astype(f32) @ params["w_static"],
        x.astype(f32) @ params["w_nbr"],
        neighbor_x.astype(f32) @ params["w_nbr2"],
    ], axis=1)                                               # [N, 4H]
    xw_feat = x.astype(f32) @ params["w_feat"]               # [N, H]
    b_gcn = jnp.concatenate([params["b_struct"], params["b_static"],
                             params["b_nbr"], params["b_nbr2"]], axis=1)  # [1,4H]
    # Classifier split at the gcn/feat row boundary + lane-dense class padding.
    w_out_gcn = jnp.zeros((h4, cp), f32).at[:, :c].set(params["w_out"][:h4, :])
    w_out_feat = jnp.zeros((h, cp), f32).at[:, :c].set(params["w_out"][h4:, :])
    b_out_p = jnp.zeros((1, cp), f32).at[:, :c].set(params["b_out"])

    # ---- compress the HBM-streamed operands when requested ------------------
    if use_bf16:
        a_k = a_norm.astype(jnp.bfloat16)        # halves the A DMA traffic
        xw_gcn_k = xw_gcn.astype(jnp.bfloat16)   # resident MXU operand
        a_bytes = xw_bytes = 2
    else:
        a_k = a_norm.astype(f32)
        xw_gcn_k = xw_gcn
        a_bytes = xw_bytes = 4
    # TODO(synk): int8 A (v5e/v6e MXU) or fp8 A (v7x) would halve A traffic
    # again, but each needs its own tolerance validation, so not enabled here.

    vmem_cap = _vmem_capacity_bytes()
    tm_sel, ceiling = _select_row_tile(n, h, cp, a_bytes, xw_bytes, vmem_cap, tm)
    if use_bf16 and n >= 16:
        # bf16 rows pack in pairs along sublanes: keep the A row block 16-aligned.
        tm_sel = min(n, max(16, ((tm_sel + 15) // 16) * 16))
    grid = (pl.cdiv(n, tm_sel),)
    # TODO(synk): for very large N, add an 'arbitrary' column grid axis over A
    # with a VMEM f32 accumulator so one row block never exceeds v7x's 64 MiB.

    def run(single_buffer_residents):
        res_kw = ({"pipeline_mode": pl.Buffered(1)}
                  if single_buffer_residents else {})

        def resident(shape):
            return pl.BlockSpec(shape, lambda i: (0, 0), **res_kw)

        rb = 1 if single_buffer_residents else 2
        vmem_limit = int(min(
            max(_estimate_vmem_bytes(tm_sel, n, h, cp, a_bytes, xw_bytes, rb),
                8 << 20),
            ceiling))
        return pl.pallas_call(
            hope_kernel,
            out_shape=jax.ShapeDtypeStruct((n, cp), jnp.float32),
            grid=grid,
            in_specs=[
                pl.BlockSpec((tm_sel, n), lambda i: (i, 0)),   # A row block
                resident((n, h4)),                             # XW_gcn (resident)
                pl.BlockSpec((tm_sel, h), lambda i: (i, 0)),   # XW_feat row block
                resident((1, h4)),                             # b_gcn
                resident((1, h)),                              # b_feat
                resident((h4, cp)),                            # w_out (gcn rows)
                resident((h, cp)),                             # w_out (feat rows)
                resident((1, cp)),                             # b_out
            ],
            out_specs=pl.BlockSpec((tm_sel, cp), lambda i: (i, 0)),
            compiler_params=pltpu.CompilerParams(
                dimension_semantics=("parallel",),
                vmem_limit_bytes=vmem_limit),
        )(a_k, xw_gcn_k, xw_feat, b_gcn, b_feat, w_out_gcn, w_out_feat, b_out_p)

    try:
        out_p = jax.block_until_ready(run(True))
    except Exception:
        # Installed Pallas rejected single-buffered residents; fall back to the
        # default double-buffered pipeline (numerically identical).
        out_p = jax.block_until_ready(run(False))
    return out_p[:, :c]


# -----------------------------------------------------------------------------
# Preprocessing glue (HOPE.preprocess equivalents), plain numpy — not the hot path.
# -----------------------------------------------------------------------------
def build_edge_index(n):
    edges = [(i, (i + 1) % n) for i in range(n)]
    edges += [(i, (i + n // 2) % n) for i in range(0, n, 4)]
    ei = []
    for (u, v) in edges:
        ei.append((u, v))
        ei.append((v, u))
    return np.array(ei, dtype=np.int64).T  # [2, E], symmetric, no self loops


def dense_adj(edge_index, n):
    a = np.zeros((n, n), dtype=np.float32)
    a[edge_index[0], edge_index[1]] = 1.0
    return a


def gcn_norm_adj(a):
    n = a.shape[0]
    a_hat = a + np.eye(n, dtype=np.float32)
    deg = a_hat.sum(axis=1)
    dinv = 1.0 / np.sqrt(np.maximum(deg, 1e-12))
    return (dinv[:, None] * a_hat * dinv[None, :]).astype(np.float32)


def make_neighbor_features_np(a, x):
    deg = a.sum(axis=1)
    deg_inv = np.where(deg > 0, 1.0 / np.maximum(deg, 1e-12), 0.0)
    return ((a * deg_inv[:, None]) @ x).astype(np.float32)


def make_static_features_np(a):
    # TODO(synk): networkx centrality features (clustering, betweenness, ...) have
    # no clean in-script equivalent; deterministic degree/index-based proxies keep
    # the [N, 9] shape. This is preprocess-time glue, outside the forward pass.
    n = a.shape[0]
    deg = a.sum(axis=1)
    idx = np.arange(n, dtype=np.float32)
    feats = np.stack([
        deg / max(deg.max(), 1.0),
        deg / n,
        1.0 / (deg + 1.0),
        np.sqrt(deg),
        (a @ deg) / max((a @ deg).max(), 1.0),
        np.sin(idx),
        np.cos(idx),
        (idx % 4) / 4.0,
        np.ones(n, dtype=np.float32),
    ], axis=1).astype(np.float32)
    return feats


def make_structural_features_np(a, num_features):
    f_norm = float((a ** 2).sum())
    u, s, _ = np.linalg.svd(a)
    k = num_features // 2
    if np.sum(s[:k] ** 2) / f_norm < 0.9:
        return (u[:, :k] * s[None, :k]).astype(np.float32)
    kk = max(int(a.shape[0] * 0.9), 1)
    sarr = s[:kk] ** 2
    idx = int(np.where(np.cumsum(sarr) / f_norm >= 0.9)[0][0])
    idx = max(idx, 1)
    return (u[:, :idx] * s[None, :idx]).astype(np.float32)


def l2_normalize(x, eps=1e-12):
    norm = np.sqrt((x ** 2).sum(axis=1, keepdims=True))
    return (x / np.maximum(norm, eps)).astype(np.float32)


# -----------------------------------------------------------------------------
# Pure-numpy reference of HOPE.forward for verification.
# -----------------------------------------------------------------------------
def reference_forward(a, struct_x, static_x, x, nbr_x, p):
    def gcn(xx, w, b):
        return np.maximum(a @ (xx @ w) + b, 0.0)
    s_h = gcn(struct_x, p["w_struct"], p["b_struct"])
    st_h = gcn(static_x, p["w_static"], p["b_static"])
    n_h = gcn(x, p["w_nbr"], p["b_nbr"])
    n2_h = gcn(nbr_x, p["w_nbr2"], p["b_nbr2"])
    f_h = np.maximum(x @ p["w_feat"] + p["b_feat"], 0.0)
    cat = np.concatenate([s_h, st_h, n_h, n2_h, f_h], axis=1)
    return cat @ p["w_out"] + p["b_out"]


if __name__ == "__main__":
    N = 16          # num nodes
    F_IN = 8        # num_features
    H = 16          # num_hidden
    C = 4           # num_class
    TM = 8          # node row-tile (exercises a 2-step parallel grid in f32)
    # num_layers = 1 (module default)

    edge_index = build_edge_index(N)
    a = dense_adj(edge_index, N)                     # raw adjacency (no self loops)
    a_norm = gcn_norm_adj(a)                         # GCN propagation matrix

    key = jax.random.PRNGKey(0)
    kx, *wkeys = jax.random.split(key, 14)
    x = np.asarray(jax.random.normal(kx, (N, F_IN), dtype=jnp.float32))

    struct_x = l2_normalize(make_structural_features_np(a, F_IN))
    static_x = l2_normalize(make_static_features_np(a))
    neighbor_x = l2_normalize(make_neighbor_features_np(a, x))

    d_struct = struct_x.shape[1]
    d_static = static_x.shape[1]
    d_nbr2 = neighbor_x.shape[1]

    def init_linear(kw, kb, fan_in, fan_out):
        bound = 1.0 / np.sqrt(fan_in)
        w = np.asarray(jax.random.uniform(kw, (fan_in, fan_out),
                                          minval=-bound, maxval=bound,
                                          dtype=jnp.float32))
        b = np.asarray(jax.random.uniform(kb, (1, fan_out),
                                          minval=-bound, maxval=bound,
                                          dtype=jnp.float32))
        return w, b

    w_struct, b_struct = init_linear(wkeys[0], wkeys[1], d_struct, H)
    w_static, b_static = init_linear(wkeys[2], wkeys[3], d_static, H)
    w_nbr,    b_nbr    = init_linear(wkeys[4], wkeys[5], F_IN, H)
    w_nbr2,   b_nbr2   = init_linear(wkeys[6], wkeys[7], d_nbr2, H)
    w_feat,   b_feat   = init_linear(wkeys[8], wkeys[9], F_IN, H)
    w_out,    b_out    = init_linear(wkeys[10], wkeys[11], 5 * H, C)

    params = dict(w_struct=w_struct, b_struct=b_struct,
                  w_static=w_static, b_static=b_static,
                  w_nbr=w_nbr, b_nbr=b_nbr,
                  w_nbr2=w_nbr2, b_nbr2=b_nbr2,
                  w_feat=w_feat, b_feat=b_feat,
                  w_out=w_out, b_out=b_out)
    jparams = {k: jnp.asarray(v) for k, v in params.items()}

    ref = reference_forward(a_norm, struct_x, static_x, x, neighbor_x, params)

    # f32 path (exact): verify against the numpy reference.
    out = hope_forward(jnp.asarray(a_norm), jnp.asarray(struct_x),
                       jnp.asarray(static_x), jnp.asarray(x),
                       jnp.asarray(neighbor_x), jparams, tm=TM)
    out = jax.block_until_ready(out)
    assert out.shape == (N, C), out.shape
    np.testing.assert_allclose(np.asarray(out), ref, rtol=1e-4, atol=1e-4)

    # bf16-in-HBM A / XW path (f32 accumulation): loose check.
    out_bf16 = hope_forward(jnp.asarray(a_norm), jnp.asarray(struct_x),
                            jnp.asarray(static_x), jnp.asarray(x),
                            jnp.asarray(neighbor_x), jparams, tm=TM,
                            use_bf16=True)
    out_bf16 = jax.block_until_ready(out_bf16)
    np.testing.assert_allclose(np.asarray(out_bf16), ref, rtol=5e-2, atol=5e-2)

    print("KERNEL_OK")
</pallas_src>

<mosaic_0001>
module attributes {stable_mosaic.version = 11 : i64} {
  func.func @hope_kernel(%arg0: i32, %arg1: memref<8x16xf32, #tpu.memory_space<vmem>>, %arg2: memref<16x64xf32, #tpu.memory_space<vmem>>, %arg3: memref<8x16xf32, #tpu.memory_space<vmem>>, %arg4: memref<1x64xf32, #tpu.memory_space<vmem>>, %arg5: memref<1x16xf32, #tpu.memory_space<vmem>>, %arg6: memref<64x128xf32, #tpu.memory_space<vmem>>, %arg7: memref<16x128xf32, #tpu.memory_space<vmem>>, %arg8: memref<1x128xf32, #tpu.memory_space<vmem>>, %arg9: memref<8x128xf32, #tpu.memory_space<vmem>>) attributes {dimension_semantics = [#tpu.dimension_semantics<parallel>], iteration_bounds = array<i64: 2>, scalar_prefetch = 0 : i64, scratch_operands = 0 : i64, tpu.core_type = #tpu.core_type<tc>, window_params = [{transform_indices = @transform_0, window_bounds = array<i64: 8, 16>}, {pipeline_mode = #tpu.pipeline_mode<synchronous>, transform_indices = @transform_1, window_bounds = array<i64: 16, 64>}, {transform_indices = @transform_2, window_bounds = array<i64: 8, 16>}, {pipeline_mode = #tpu.pipeline_mode<synchronous>, transform_indices = @transform_3, window_bounds = array<i64: 1, 64>}, {pipeline_mode = #tpu.pipeline_mode<synchronous>, transform_indices = @transform_4, window_bounds = array<i64: 1, 16>}, {pipeline_mode = #tpu.pipeline_mode<synchronous>, transform_indices = @transform_5, window_bounds = array<i64: 64, 128>}, {pipeline_mode = #tpu.pipeline_mode<synchronous>, transform_indices = @transform_6, window_bounds = array<i64: 16, 128>}, {pipeline_mode = #tpu.pipeline_mode<synchronous>, transform_indices = @transform_7, window_bounds = array<i64: 1, 128>}, {transform_indices = @transform_8, window_bounds = array<i64: 8, 128>}]} {
    %c0 = arith.constant 0 : index
    %c0_0 = arith.constant 0 : index
    %0 = vector.load %arg1[%c0, %c0_0] : memref<8x16xf32, #tpu.memory_space<vmem>>, vector<8x16xf32>
    %c0_1 = arith.constant 0 : index
    %c0_2 = arith.constant 0 : index
    %1 = vector.load %arg2[%c0_1, %c0_2] : memref<16x64xf32, #tpu.memory_space<vmem>>, vector<16x64xf32>
    %cst = arith.constant dense<0.000000e+00> : vector<8x64xf32>
    %2 = tpu.matmul %0, %1, %cst {dimension_numbers = #tpu.dot_dimension_numbers<[1], [0], [0], [1], [0, 0, 1, 1], [], []>} : vector<8x16xf32>, vector<16x64xf32>, vector<8x64xf32> -> vector<8x64xf32>
    %c0_3 = arith.constant 0 : index
    %c0_4 = arith.constant 0 : index
    %3 = vector.load %arg4[%c0_3, %c0_4] : memref<1x64xf32, #tpu.memory_space<vmem>>, vector<1x64xf32>
    %4 = vector.broadcast %3 : vector<1x64xf32> to vector<8x64xf32>
    %5 = arith.addf %2, %4 : vector<8x64xf32>
    %cst_5 = arith.constant 0.000000e+00 : f32
    %6 = vector.broadcast %cst_5 : f32 to vector<8x64xf32>
    %7 = arith.maximumf %5, %6 : vector<8x64xf32>
    %c0_6 = arith.constant 0 : index
    %c0_7 = arith.constant 0 : index
    %8 = vector.load %arg3[%c0_6, %c0_7] : memref<8x16xf32, #tpu.memory_space<vmem>>, vector<8x16xf32>
    %c0_8 = arith.constant 0 : index
    %c0_9 = arith.constant 0 : index
    %9 = vector.load %arg5[%c0_8, %c0_9] : memref<1x16xf32, #tpu.memory_space<vmem>>, vector<1x16xf32>
    %10 = vector.broadcast %9 : vector<1x16xf32> to vector<8x16xf32>
    %11 = arith.addf %8, %10 : vector<8x16xf32>
    %cst_10 = arith.constant 0.000000e+00 : f32
    %12 = vector.broadcast %cst_10 : f32 to vector<8x16xf32>
    %13 = arith.maximumf %11, %12 : vector<8x16xf32>
    %c0_11 = arith.constant 0 : index
    %c0_12 = arith.constant 0 : index
    %14 = vector.load %arg6[%c0_11, %c0_12] : memref<64x128xf32, #tpu.memory_space<vmem>>, vector<64x128xf32>
    %cst_13 = arith.constant dense<0.000000e+00> : vector<8x128xf32>
    %15 = tpu.matmul %7, %14, %cst_13 {dimension_numbers = #tpu.dot_dimension_numbers<[1], [0], [0], [1], [0, 0, 1, 1], [], []>} : vector<8x64xf32>, vector<64x128xf32>, vector<8x128xf32> -> vector<8x128xf32>
    %c0_14 = arith.constant 0 : index
    %c0_15 = arith.constant 0 : index
    %16 = vector.load %arg7[%c0_14, %c0_15] : memref<16x128xf32, #tpu.memory_space<vmem>>, vector<16x128xf32>
    %cst_16 = arith.constant dense<0.000000e+00> : vector<8x128xf32>
    %17 = tpu.matmul %13, %16, %cst_16 {dimension_numbers = #tpu.dot_dimension_numbers<[1], [0], [0], [1], [0, 0, 1, 1], [], []>} : vector<8x16xf32>, vector<16x128xf32>, vector<8x128xf32> -> vector<8x128xf32>
    %18 = arith.addf %15, %17 : vector<8x128xf32>
    %c0_17 = arith.constant 0 : index
    %c0_18 = arith.constant 0 : index
    %19 = vector.load %arg8[%c0_17, %c0_18] : memref<1x128xf32, #tpu.memory_space<vmem>>, vector<1x128xf32>
    %20 = vector.broadcast %19 : vector<1x128xf32> to vector<8x128xf32>
    %21 = arith.addf %18, %20 : vector<8x128xf32>
    %c0_19 = arith.constant 0 : index
    %c0_20 = arith.constant 0 : index
    %22 = vector.load %arg9[%c0_19, %c0_20] : memref<8x128xf32, #tpu.memory_space<vmem>>, vector<8x128xf32>
    tpu.vector_store %arg9[%c0_19, %c0_20], %21 {strides = array<i32>} : memref<8x128xf32, #tpu.memory_space<vmem>>, vector<8x128xf32>,
    return
  }
  func.func @transform_0(%arg0: i32) -> (i32, i32) {
    %c0_i32 = arith.constant 0 : i32
    %c0_i32_0 = arith.constant 0 : i32
    return %arg0, %c0_i32 : i32, i32
  }
  func.func @transform_1(%arg0: i32) -> (i32, i32) {
    %c0_i32 = arith.constant 0 : i32
    %c0_i32_0 = arith.constant 0 : i32
    %c0_i32_1 = arith.constant 0 : i32
    return %c0_i32, %c0_i32_0 : i32, i32
  }
  func.func @transform_2(%arg0: i32) -> (i32, i32) {
    %c0_i32 = arith.constant 0 : i32
    %c0_i32_0 = arith.constant 0 : i32
    return %arg0, %c0_i32 : i32, i32
  }
  func.func @transform_3(%arg0: i32) -> (i32, i32) {
    %c0_i32 = arith.constant 0 : i32
    %c0_i32_0 = arith.constant 0 : i32
    %c0_i32_1 = arith.constant 0 : i32
    return %c0_i32, %c0_i32_0 : i32, i32
  }
  func.func @transform_4(%arg0: i32) -> (i32, i32) {
    %c0_i32 = arith.constant 0 : i32
    %c0_i32_0 = arith.constant 0 : i32
    %c0_i32_1 = arith.constant 0 : i32
    return %c0_i32, %c0_i32_0 : i32, i32
  }
  func.func @transform_5(%arg0: i32) -> (i32, i32) {
    %c0_i32 = arith.constant 0 : i32
    %c0_i32_0 = arith.constant 0 : i32
    %c0_i32_1 = arith.constant 0 : i32
    return %c0_i32, %c0_i32_0 : i32, i32
  }
  func.func @transform_6(%arg0: i32) -> (i32, i32) {
    %c0_i32 = arith.constant 0 : i32
    %c0_i32_0 = arith.constant 0 : i32
    %c0_i32_1 = arith.constant 0 : i32
    return %c0_i32, %c0_i32_0 : i32, i32
  }
  func.func @transform_7(%arg0: i32) -> (i32, i32) {
    %c0_i32 = arith.constant 0 : i32
    %c0_i32_0 = arith.constant 0 : i32
    %c0_i32_1 = arith.constant 0 : i32
    return %c0_i32, %c0_i32_0 : i32, i32
  }
  func.func @transform_8(%arg0: i32) -> (i32, i32) {
    %c0_i32 = arith.constant 0 : i32
    %c0_i32_0 = arith.constant 0 : i32
    return %arg0, %c0_i32 : i32, i32
  }
}

module attributes {stable_mosaic.version = 11 : i64} {
  func.func @hope_kernel(%arg0: i32, %arg1: memref<8x16xf32, #tpu.memory_space<vmem>>, %arg2: memref<16x64xf32, #tpu.memory_space<vmem>>, %arg3: memref<8x16xf32, #tpu.memory_space<vmem>>, %arg4: memref<1x64xf32, #tpu.memory_space<vmem>>, %arg5: memref<1x16xf32, #tpu.memory_space<vmem>>, %arg6: memref<64x128xf32, #tpu.memory_space<vmem>>, %arg7: memref<16x128xf32, #tpu.memory_space<vmem>>, %arg8: memref<1x128xf32, #tpu.memory_space<vmem>>, %arg9: memref<8x128xf32, #tpu.memory_space<vmem>>) attributes {dimension_semantics = [#tpu.dimension_semantics<parallel>], iteration_bounds = array<i64: 2>, scalar_prefetch = 0 : i64, scratch_operands = 0 : i64, tpu.core_type = #tpu.core_type<tc>, window_params = [{transform_indices = @transform_0, window_bounds = array<i64: 8, 16>}, {pipeline_mode = #tpu.pipeline_mode<synchronous>, transform_indices = @transform_1, window_bounds = array<i64: 16, 64>}, {transform_indices = @transform_2, window_bounds = array<i64: 8, 16>}, {pipeline_mode = #tpu.pipeline_mode<synchronous>, transform_indices = @transform_3, window_bounds = array<i64: 1, 64>}, {pipeline_mode = #tpu.pipeline_mode<synchronous>, transform_indices = @transform_4, window_bounds = array<i64: 1, 16>}, {pipeline_mode = #tpu.pipeline_mode<synchronous>, transform_indices = @transform_5, window_bounds = array<i64: 64, 128>}, {pipeline_mode = #tpu.pipeline_mode<synchronous>, transform_indices = @transform_6, window_bounds = array<i64: 16, 128>}, {pipeline_mode = #tpu.pipeline_mode<synchronous>, transform_indices = @transform_7, window_bounds = array<i64: 1, 128>}, {transform_indices = @transform_8, window_bounds = array<i64: 8, 128>}]} {
    %c0 = arith.constant 0 : index
    %c0_0 = arith.constant 0 : index
    %0 = vector.load %arg1[%c0, %c0_0] : memref<8x16xf32, #tpu.memory_space<vmem>>, vector<8x16xf32>
    %c0_1 = arith.constant 0 : index
    %c0_2 = arith.constant 0 : index
    %1 = vector.load %arg2[%c0_1, %c0_2] : memref<16x64xf32, #tpu.memory_space<vmem>>, vector<16x64xf32>
    %cst = arith.constant dense<0.000000e+00> : vector<8x64xf32>
    %2 = tpu.matmul %0, %1, %cst {dimension_numbers = #tpu.dot_dimension_numbers<[1], [0], [0], [1], [0, 0, 1, 1], [], []>} : vector<8x16xf32>, vector<16x64xf32>, vector<8x64xf32> -> vector<8x64xf32>
    %c0_3 = arith.constant 0 : index
    %c0_4 = arith.constant 0 : index
    %3 = vector.load %arg4[%c0_3, %c0_4] : memref<1x64xf32, #tpu.memory_space<vmem>>, vector<1x64xf32>
    %4 = vector.broadcast %3 : vector<1x64xf32> to vector<8x64xf32>
    %5 = arith.addf %2, %4 : vector<8x64xf32>
    %cst_5 = arith.constant 0.000000e+00 : f32
    %6 = vector.broadcast %cst_5 : f32 to vector<8x64xf32>
    %7 = arith.maximumf %5, %6 : vector<8x64xf32>
    %c0_6 = arith.constant 0 : index
    %c0_7 = arith.constant 0 : index
    %8 = vector.load %arg3[%c0_6, %c0_7] : memref<8x16xf32, #tpu.memory_space<vmem>>, vector<8x16xf32>
    %c0_8 = arith.constant 0 : index
    %c0_9 = arith.constant 0 : index
    %9 = vector.load %arg5[%c0_8, %c0_9] : memref<1x16xf32, #tpu.memory_space<vmem>>, vector<1x16xf32>
    %10 = vector.broadcast %9 : vector<1x16xf32> to vector<8x16xf32>
    %11 = arith.addf %8, %10 : vector<8x16xf32>
    %cst_10 = arith.constant 0.000000e+00 : f32
    %12 = vector.broadcast %cst_10 : f32 to vector<8x16xf32>
    %13 = arith.maximumf %11, %12 : vector<8x16xf32>
    %c0_11 = arith.constant 0 : index
    %c0_12 = arith.constant 0 : index
    %14 = vector.load %arg6[%c0_11, %c0_12] : memref<64x128xf32, #tpu.memory_space<vmem>>, vector<64x128xf32>
    %cst_13 = arith.constant dense<0.000000e+00> : vector<8x128xf32>
    %15 = tpu.matmul %7, %14, %cst_13 {dimension_numbers = #tpu.dot_dimension_numbers<[1], [0], [0], [1], [0, 0, 1, 1], [], []>} : vector<8x64xf32>, vector<64x128xf32>, vector<8x128xf32> -> vector<8x128xf32>
    %c0_14 = arith.constant 0 : index
    %c0_15 = arith.constant 0 : index
    %16 = vector.load %arg7[%c0_14, %c0_15] : memref<16x128xf32, #tpu.memory_space<vmem>>, vector<16x128xf32>
    %cst_16 = arith.constant dense<0.000000e+00> : vector<8x128xf32>
    %17 = tpu.matmul %13, %16, %cst_16 {dimension_numbers = #tpu.dot_dimension_numbers<[1], [0], [0], [1], [0, 0, 1, 1], [], []>} : vector<8x16xf32>, vector<16x128xf32>, vector<8x128xf32> -> vector<8x128xf32>
    %18 = arith.addf %15, %17 : vector<8x128xf32>
    %c0_17 = arith.constant 0 : index
    %c0_18 = arith.constant 0 : index
    %19 = vector.load %arg8[%c0_17, %c0_18] : memref<1x128xf32, #tpu.memory_space<vmem>>, vector<1x128xf32>
    %20 = vector.broadcast %19 : vector<1x128xf32> to vector<8x128xf32>
    %21 = arith.addf %18, %20 : vector<8x128xf32>
    %c0_19 = arith.constant 0 : index
    %c0_20 = arith.constant 0 : index
    %22 = vector.load %arg9[%c0_19, %c0_20] : memref<8x128xf32, #tpu.memory_space<vmem>>, vector<8x128xf32>
    tpu.vector_store %arg9[%c0_19, %c0_20], %21 {strides = array<i32>} : memref<8x128xf32, #tpu.memory_space<vmem>>, vector<8x128xf32>,
    return
  }
  func.func @transform_0(%arg0: i32) -> (i32, i32) {
    %c0_i32 = arith.constant 0 : i32
    %c0_i32_0 = arith.constant 0 : i32
    return %arg0, %c0_i32 : i32, i32
  }
  func.func @transform_1(%arg0: i32) -> (i32, i32) {
    %c0_i32 = arith.constant 0 : i32
    %c0_i32_0 = arith.constant 0 : i32
    %c0_i32_1 = arith.constant 0 : i32
    return %c0_i32, %c0_i32_0 : i32, i32
  }
  func.func @transform_2(%arg0: i32) -> (i32, i32) {
    %c0_i32 = arith.constant 0 : i32
    %c0_i32_0 = arith.constant 0 : i32
    return %arg0, %c0_i32 : i32, i32
  }
  func.func @transform_3(%arg0: i32) -> (i32, i32) {
    %c0_i32 = arith.constant 0 : i32
    %c0_i32_0 = arith.constant 0 : i32
    %c0_i32_1 = arith.constant 0 : i32
    return %c0_i32, %c0_i32_0 : i32, i32
  }
  func.func @transform_4(%arg0: i32) -> (i32, i32) {
    %c0_i32 = arith.constant 0 : i32
    %c0_i32_0 = arith.constant 0 : i32
    %c0_i32_1 = arith.constant 0 : i32
    return %c0_i32, %c0_i32_0 : i32, i32
  }
  func.func @transform_5(%arg0: i32) -> (i32, i32) {
    %c0_i32 = arith.constant 0 : i32
    %c0_i32_0 = arith.constant 0 : i32
    %c0_i32_1 = arith.constant 0 : i32
    return %c0_i32, %c0_i32_0 : i32, i32
  }
  func.func @transform_6(%arg0: i32) -> (i32, i32) {
    %c0_i32 = arith.constant 0 : i32
    %c0_i32_0 = arith.constant 0 : i32
    %c0_i32_1 = arith.constant 0 : i32
    return %c0_i32, %c0_i32_0 : i32, i32
  }
  func.func @transform_7(%arg0: i32) -> (i32, i32) {
    %c0_i32 = arith.constant 0 : i32
    %c0_i32_0 = arith.constant 0 : i32
    %c0_i32_1 = arith.constant 0 : i32
    return %c0_i32, %c0_i32_0 : i32, i32
  }
  func.func @transform_8(%arg0: i32) -> (i32, i32) {
    %c0_i32 = arith.constant 0 : i32
    %c0_i32_0 = arith.constant 0 : i32
    return %arg0, %c0_i32 : i32, i32
  }
}

</mosaic_0001>

<bundles_post_ra>
// kernel: tpu_custom_call.1
= control target key start
LH: loop header
LB: loop body
LE: loop exit
PB: predicated region body
PF: predicated region fallthrough
CT: control target
= control target key end

     0   :  { %s1484_s0 = inlined_call_operand.hbm [shape: f32[16,16], index: 0, kind: input, shape index: {}]   ;;  %s1485_s1 = inlined_call_operand.hbm [shape: f32[16,64], index: 1, kind: input, shape index: {}]   ;;  %s1486_s2 = inlined_call_operand.hbm [shape: f32[16,16], index: 2, kind: input, shape index: {}]   ;;  %s1487_s3 = inlined_call_operand.vmem [shape: f32[1,64], index: 3, kind: input, shape index: {}]   ;;  %s1488_s4 = inlined_call_operand.vmem [shape: f32[1,16], index: 4, kind: input, shape index: {}]   ;;  %s1489_s5 = inlined_call_operand.hbm [shape: f32[64,128], index: 5, kind: input, shape index: {}]   ;;  %s1490_s6 = inlined_call_operand.hbm [shape: f32[16,128], index: 6, kind: input, shape index: {}]   ;;  %s1491_s7 = inlined_call_operand.vmem [shape: f32[1,128], index: 7, kind: input, shape index: {}]   ;;  %s1492_s8 = inlined_call_operand.hbm [shape: f32[16,128], index: 8, kind: output, shape index: {}]  }
   0x1   :  { %1506 = sst [smem:[#allocation22_spill]] %s1485_s1 }
   0x2   :  { %13 = vsyncpa [#allocation3], 0 }
   0x3   :  { %15 = vsyncpa [#allocation3 + $0x1], 0 }
   0x4   :  { %16 = vsyncpa [#allocation6], 0 }
   0x5   :  { %17 = vsyncpa [#allocation10], 0 }
   0x6   :  { %18 = vsyncpa [#allocation4], 0 }
   0x7   :  { %20 = vsyncpa [#allocation4 + $0x1], 0  ;;  %s1225_s27 = smov 0   ;;  %s1227_s28 = smov 0  }
   0x8   :  { %s1229_s29 = smov 0   ;;  %s1231_s30 = smov 0  }
   0x9 LB: > { %1507 = sst [smem:[#allocation18_spill]] %s1164_s29  ;;  %s1246_s9 = sadd.s32 4294967295, %s1168_s30   ;;  %s1168_s30 = sphi %s1231_s30, %s1534_s30   ;;  %s1164_s29 = sphi %s1229_s29, %s1536_s29   ;;  %s1160_s28 = sphi %s1227_s28, %s1538_s28   ;;  %s1156_s27 = sphi %s1225_s27, %s1537_s27  }
   0xa   : > { %1508 = sst [smem:[#allocation19_spill]] %s1168_s30  ;;  %s793_s10 = sadd.s32 4294967294, %s1168_s30  }
   0xb   : > { %p46_p0 = scmp.ne.s32.totalorder %s1160_s28, %s1156_s27  ;;  %p1501_p1 = scmp.eq.s32.totalorder %s1246_s9, 0 }
   0xc   : > { %p222_p2 = scmp.eq.s32.totalorder %s1246_s9, 1  ;;  %p228_p3 = scmp.eq.s32.totalorder %s793_s10, 1 }
   0xd   : > { %p1255_p4 = por %p1501_p1, %p46_p0  ;;  %p794_p5 = scmp.ge.s32.totalorder %s1168_s30, 1 }
   0xe   : > { %p1260_p6 = por %p228_p3, %p46_p0  ;;  %p235_p7 = scmp.lt.s32.totalorder %s1168_s30, 3 }
   0xf   : > { %s1509_s11 = scalar_select %p1255_p4, 1, 0 }
  0x10   : > { %s1510_s12 = scalar_select %p1260_p6, 1, 0 }
  0x11   : > { %p1265_p8 = pnand %p794_p5, %p235_p7  ;;  %s1170_s14 = smov [#allocation5]  }
  0x12   : > { %s247_s15 = sshll.u32 %s1170_s14, 4  ;;  %s1279_s17 = sadd.s32 1, %s1168_s30   ;;  %s248_s15 = int_to_ptr.vmem [resolvable:$true] %s247_s15 }
  0x13   : > { %s1511_s13 = scalar_select %p1265_p8, 1, 0 }
  0x14   : > { %p886_p9 = pneg %p1265_p8  ;;  %1513 = sst [smem:[#allocation20_spill]] %s1279_s17 }
  0x15   : > { %s33_s18 = sadd.s32 1, %s1164_s29  ;;  %s30_s19 = ssub.s32 %s1168_s30, %s1279_s17 }
  0x16   : > { %p1274_p11 = pnand %p886_p9, %p1501_p1  ;;  %s965_s20 = scalar_lea.vmem %s248_s15, 256 }
  0x17   : > { %p966_p13 = scmp.ne.s32.totalorder %s248_s15, %s965_s20  ;;  %p973_p5 = scmp.lt.s32.totalorder %s248_s15, %s248_s15 }
  0x18   : > { %p1502_p12 = pneg %p1274_p11  ;;  %p974_p7 = scmp.lt.s32.totalorder %s965_s20, %s965_s20 }
  0x1a   : > { %p968_p0 = pnand %p966_p13, %p1502_p12  ;;  %p975_p9 = por %p974_p7, %p973_p5 }
  0x1c   : > { %p969_p3 = pneg %p968_p0 }
  0x1e   : > { %p976_p10 = pnand %p975_p9, %p969_p3 }
  0x20   : > { %979 = shalt.err (!%p976_p10)
}
  0x21   : > { %s1495_s21 = smov 128   ;;  %s1497_s22 = smov 8  }
  0x22   : > { %s1514_s1 = sld [smem:[#allocation22_spill]]  ;;  %p31_p10 = scmp.eq.s32.totalorder %s30_s19, 0 }
  0x23   : > { %p40_p13 = scmp.ne.s32.totalorder %s1164_s29, %s1160_s28  ;;  %p41_p0 = scmp.eq.s32.totalorder %s1168_s30, 0 }
  0x24   : > { %p910_p3 = scmp.lt.s32.totalorder %s1168_s30, 2  ;;  %s296_s10 = sand.u32 1, %s1168_s30  }
  0x25   : > { %s1302_s25 = scalar_select %p31_p10, %s1164_s29, %s33_s18  }
  0x26   : > { %p42_p5 = por %p41_p0, %p40_p13  ;;  %p1306_p7 = por %p222_p2, %p40_p13 }
  0x27   : > { %1515 = sst [smem:[#allocation21_spill]] %s1302_s25  ;;  %s298_s14 = sand.u32 1, %s1164_s29  }
  0x28   : > { %889 = dma.hbm_to_vmem [thread:$0]  (!%p1274_p11), %s1514_s1, 256, %s248_s15, [#allocation6], %s1495_s21, %s1495_s21, %s1497_s22  }
  0x29   : > { %s1516_s26 = scalar_select %p1306_p7, 1, 0 }
  0x2a   : > { %s1312_s20 = sshll.u32 %s298_s14, 3  ;;  %s800_s17 = sshll.u32 %s1168_s30, 7 }
  0x2b   : > { %s1318_s19 = scalar_lea.hbm %s1484_s0, %s800_s17  ;;  %s300_s18 = scalar_lea.vmem [#allocation2], %s1312_s20 }
  0x2c   : > { %s307_s24 = sshll.u32 %s300_s18, 4  ;;  %p1323_p2 = pnand %p910_p3, %p42_p5  ;;  %s1321_s24 = int_to_ptr.vmem [resolvable:$true] %s307_s24 }
  0x2d   : > { %s1330_s1 = scalar_lea.hbm %s1486_s2, %s800_s17  ;;  %s1332_s23 = scalar_lea.sflag [#allocation3], %s296_s10 }
  0x2e   : > { %s980_s15 = scalar_lea.hbm %s1318_s19, 128  ;;  %p982_p10 = pneg %p1323_p2 }
  0x2f   : > { %p981_p9 = scmp.ne.s32.totalorder %s1318_s19, %s980_s15  ;;  %s985_s29 = scalar_lea.hbm %s1484_s0, 256 }
  0x30   : > { %p986_p3 = scmp.lt.s32.totalorder %s1318_s19, %s1484_s0  ;;  %p987_p5 = scmp.lt.s32.totalorder %s985_s29, %s980_s15 }
  0x31   : > { %p983_p13 = pnand %p982_p10, %p981_p9 }
  0x32   : > { %p988_p1 = por %p987_p5, %p986_p3 }
  0x33   : > { %p984_p0 = pneg %p983_p13 }
  0x35   : > { %p989_p12 = pnand %p988_p1, %p984_p0 }
  0x37   : > { %992 = shalt.err (!%p989_p12)
}
  0x38   : > { %s993_s17 = scalar_lea.vmem %s1321_s24, 128  ;;  %s1173_s25 = smov [#allocation2]  }
  0x39   : > { %p994_p6 = scmp.ne.s32.totalorder %s1321_s24, %s993_s17  ;;  %s998_s10 = sshll.u32 %s1173_s25, 4  ;;  %s999_s10 = int_to_ptr.vmem [resolvable:$false] %s998_s10 }
  0x3a   : > { %s1000_s14 = scalar_lea.vmem %s999_s10, 256  ;;  %p1001_p7 = scmp.lt.s32.totalorder %s1321_s24, %s999_s10 }
  0x3b   : > { %p996_p9 = pnand %p994_p6, %p982_p10  ;;  %p1002_p4 = scmp.lt.s32.totalorder %s1000_s14, %s993_s17 }
  0x3d   : > { %p997_p13 = pneg %p996_p9  ;;  %p1003_p8 = por %p1002_p4, %p1001_p7 }
  0x3f   : > { %p1004_p3 = pnand %p1003_p8, %p997_p13 }
  0x41   : > { %1007 = shalt.err (!%p1004_p3)
}
  0x42   : > { %899 = dma.hbm_to_vmem [thread:$0]  (!%p1323_p2), %s1318_s19, 128, %s1321_s24, %s1332_s23  }
  0x43   : > { %s1174_s29 = smov [#allocation8]   ;;  %s1175_s15 = smov [#allocation9]  }
  0x44   : > { %s266_s30 = sshll.u32 %s1174_s29, 4  ;;  %s279_s18 = sshll.u32 %s1175_s15, 4  ;;  %s267_s30 = int_to_ptr.vmem [resolvable:$true] %s266_s30  ;;  %s280_s18 = int_to_ptr.vmem [resolvable:$true] %s279_s18 }
  0x45   : > { %s1019_s22 = scalar_lea.vmem %s267_s30, 1024  ;;  %p1518_p6 = pneg %p1274_p11 }
  0x46   : > { %p1020_p1 = scmp.ne.s32.totalorder %s267_s30, %s1019_s22  ;;  %p1027_p8 = scmp.lt.s32.totalorder %s267_s30, %s267_s30 }
  0x47   : > { %p1028_p7 = scmp.lt.s32.totalorder %s1019_s22, %s1019_s22 }
  0x48   : > { %p1022_p12 = pnand %p1020_p1, %p1518_p6 }
  0x49   : > { %p1029_p0 = por %p1028_p7, %p1027_p8 }
  0x4a   : > { %p1023_p4 = pneg %p1022_p12 }
  0x4c   : > { %p1030_p5 = pnand %p1029_p0, %p1023_p4 }
  0x4e   : > { %1033 = shalt.err (!%p1030_p5)
}
  0x4f   : > { %s1519_s17 = smov 8   ;;  %s1520_s19 = smov 128  }
  0x50   : > { %892 = dma.hbm_to_vmem [thread:$0]  (!%p1274_p11), %s1489_s5, 1024, %s267_s30, [#allocation6], %s1520_s19, %s1520_s19, %s1519_s17  }
  0x51   : > { %s318_s10 = scalar_lea.vmem [#allocation7], %s1312_s20  ;;  %s1045_s29 = scalar_lea.vmem %s280_s18, 256 }
  0x52   : > { %s325_s14 = sshll.u32 %s318_s10, 4  ;;  %p1046_p9 = scmp.ne.s32.totalorder %s280_s18, %s1045_s29  ;;  %s326_s14 = int_to_ptr.vmem [resolvable:$true] %s325_s14 }
  0x53   : > { %p1521_p13 = pmov %p1518_p6  ;;  %p1053_p6 = scmp.lt.s32.totalorder %s280_s18, %s280_s18 }
  0x54   : > { %p1054_p12 = scmp.lt.s32.totalorder %s1045_s29, %s1045_s29 }
  0x55   : > { %p1048_p3 = pnand %p1046_p9, %p1521_p13 }
  0x56   : > { %p1055_p4 = por %p1054_p12, %p1053_p6 }
  0x57   : > { %p1049_p1 = pneg %p1048_p3 }
  0x59   : > { %p1056_p8 = pnand %p1055_p4, %p1049_p1 }
  0x5b   : > { %1059 = shalt.err (!%p1056_p8)
}
  0x5c   : > { %895 = dma.hbm_to_vmem [thread:$0]  (!%p1274_p11), %s1490_s6, 256, %s280_s18, [#allocation10], %s1520_s19, %s1520_s19, %s1519_s17  }
  0x5d   : > { %s1060_s20 = scalar_lea.hbm %s1330_s1, 128  ;;  %s1065_s24 = scalar_lea.hbm %s1486_s2, 256 }
  0x5e   : > { %p1061_p7 = scmp.ne.s32.totalorder %s1330_s1, %s1060_s20  ;;  %p1066_p9 = scmp.lt.s32.totalorder %s1330_s1, %s1486_s2 }
  0x5f   : > { %p1067_p13 = scmp.lt.s32.totalorder %s1065_s24, %s1060_s20 }
  0x60   : > { %p1063_p0 = pnand %p1061_p7, %p982_p10 }
  0x61   : > { %p1068_p3 = por %p1067_p13, %p1066_p9 }
  0x62   : > { %p1064_p5 = pneg %p1063_p0 }
  0x64   : > { %p1069_p1 = pnand %p1068_p3, %p1064_p5 }
  0x66   : > { %1072 = shalt.err (!%p1069_p1)
}
  0x67   : > { %s1073_s18 = scalar_lea.vmem %s326_s14, 128  ;;  %s1176_s17 = smov [#allocation7]  }
  0x68   : > { %p1074_p11 = scmp.ne.s32.totalorder %s326_s14, %s1073_s18  ;;  %s1078_s19 = sshll.u32 %s1176_s17, 4  ;;  %s1079_s19 = int_to_ptr.vmem [resolvable:$false] %s1078_s19 }
  0x69   : > { %s1080_s29 = scalar_lea.vmem %s1079_s19, 256  ;;  %p1081_p4 = scmp.lt.s32.totalorder %s326_s14, %s1079_s19 }
  0x6a   : > { %p1076_p6 = pnand %p1074_p11, %p982_p10  ;;  %p1082_p8 = scmp.lt.s32.totalorder %s1080_s29, %s1073_s18 }
  0x6c   : > { %p1077_p12 = pneg %p1076_p6  ;;  %p1083_p7 = por %p1082_p8, %p1081_p4 }
  0x6e   : > { %p1084_p0 = pnand %p1083_p7, %p1077_p12 }
  0x70   : > { %1087 = shalt.err (!%p1084_p0)
}
  0x71   : > { %902 = dma.hbm_to_vmem [thread:$0]  (!%p1323_p2), %s1330_s1, 128, %s326_s14, %s1332_s23  }
  0x72   : > { %p1522_p5 = scmp.ne.s32.totalorder %s1511_s13, 0 }
  0x73   : > { %s336_s30 = sand.u32 (!%p1522_p5), 1, %s1246_s9   ;;  %s338_s15 = sand.u32 (!%p1522_p5), 1, %s1160_s28  }
  0x74   : > { %334 = sbr.rel (%p1522_p5) target bundleno = 547 (0x223), region = 52  ;;  %s1407_s20 = sshll.u32 (!%p1522_p5), %s338_s15, 3 }
  0x75   : > { %s337_s22 = scalar_lea.sflag (!%p1522_p5), [#allocation3], %s336_s30  ;;  %s340_s16 = scalar_lea.vmem (!%p1522_p5), [#allocation2], %s1407_s20 }
  0x76   : > { %p1523_p10 = scmp.ne.s32.totalorder (!%p1522_p5), %s1509_s11, 0 }
  0x79   : > { %1131 = dma.done.wait (%p1523_p10), %s337_s22, 128  }
  0x7a   : > { %1133 = vsyncadd (%p1523_p10), %s337_s22, 4294967168  ;;  %p1524_p2 = scmp.eq.s32.totalorder %s1246_s9, 0 }
  0x7c   : > { %1135 = dma.done.wait (%p1524_p2), [#allocation6], 256   ;;  %p1525_p9 = pmov %p1524_p2 }
  0x7d   : > { %s353_s1 = scalar_lea.vmem [#allocation7], %s1407_s20 }
  0x7e   : > { %1137 = vsyncadd (%p1525_p9), [#allocation6], 4294967040 }
  0x7f   : > { %1139 = dma.done.wait (%p1523_p10), %s337_s22, 128  }
  0x80   : > { %1141 = vsyncadd (%p1523_p10), %s337_s22, 4294967168  ;;  %p1526_p13 = pmov %p1524_p2 }
  0x81   : > { %p1527_p3 = pmov %p1524_p2 }
  0x82   : > { %1143 = dma.done.wait (%p1526_p13), [#allocation6], 1024  }
  0x83   : > { %1145 = vsyncadd (%p1527_p3), [#allocation6], 4294966272  ;;  %p1528_p1 = pmov %p1524_p2 }
  0x85   : > { %1147 = dma.done.wait (%p1528_p1), [#allocation10], 256   ;;  %p1529_p11 = pmov %p1528_p1 }
  0x86   : > { %v1177_v0 = vmov 0.0   ;;  %vm1178_vm0 = vmmov 0   ;;  %v401_v1 = vld [vmem:[#allocation5 + $0x8] sm:$0xff]  ;;  %v400_v2 = vld [vmem:[#allocation5] sm:$0xff]  ;;  %v399_v3 = vld [vmem:[%s340_s16] sm:$0xff]  ;;  %vm409_vm1 = vcmask 130048  }
  0x87   : > { %1149 = vsyncadd (%p1529_p11), [#allocation10], 4294967040  ;;  %835 = vmatprep.subr.mxu1 %v1177_v0  ;;  %839 = vmatprep.mubr.msk.f32.mxu1 %vm1178_vm0, %v1177_v0  ;;  %v501_v4 = vld [vmem:[#allocation8 + $0x38] sm:$0xff]  ;;  %v500_v5 = vld [vmem:[#allocation8 + $0x30] sm:$0xff]  ;;  %vm577_vm2 = vcmask 523264   ;;  %s817_s25 = sshll.u32 %s1246_s9, 7 }
  0x88   : > { %849 = vmatprep.subr.mxu0 %v1177_v0  ;;  %865 = vmatprep.mubr.msk.f32.mxu0 %vm1178_vm0, %v1177_v0  ;;  %v499_v6 = vld [vmem:[#allocation8 + $0x28] sm:$0xff]  ;;  %v498_v7 = vld [vmem:[#allocation8 + $0x20] sm:$0xff]  ;;  %v497_v8 = vld [vmem:[#allocation8 + $0x18] sm:$0xff]  ;;  %s398_s10 = scalar_lea.vmem [#allocation11], %s1407_s20  ;;  %s672_s29 = scalar_lea.hbm %s1492_s8, %s817_s25 }
  0x89   : > { %836 = vmatpush3.msra.mxu1 %v401_v1  ;;  %850 = vmatpush3.msra.mxu0 %v501_v4  ;;  %v484_v9 = vld [vmem:[%s353_s1] sm:$0xff]  ;;  %v503_v11 = vld [vmem:[#allocation9 + $0x8] sm:$0xff]  ;;  %v502_v14 = vld [vmem:[#allocation9] sm:$0xff]  ;;  %s674_s18 = sshll.u32 %s398_s10, 4  ;;  %s661_s30 = scalar_lea.sflag [#allocation4], %s338_s15  ;;  %s675_s18 = int_to_ptr.vmem [resolvable:$true] %s674_s18 }
  0x8a   : > { %837 = vmatprep.subr.mxu1 %v1177_v0  ;;  %851 = vmatprep.subr.mxu0 %v1177_v0  ;;  %v812_v10 = vld [vmem:[%s1488_s4] ss:$0 sm:$0xff]  ;;  %v495_v15 = vld [vmem:[#allocation8 + $0x8] sm:$0xff]  ;;  %v494_v17 = vld [vmem:[#allocation8] sm:$0xff]  ;;  %s1088_s22 = scalar_lea.vmem %s675_s18, 128  ;;  %p1530_p12 = scmp.ne.s32.totalorder %s1516_s26, 0 }
  0x8b   : > { %838 = vmatpush3.msra.mxu1 %v400_v2  ;;  %852 = vmatpush3.msra.mxu0 %v500_v5  ;;  %v496_v12 = vld [vmem:[#allocation8 + $0x10] sm:$0xff]  ;;  %v492_v13 = vadd.f32 %v812_v10, %v484_v9  ;;  %p1089_p6 = scmp.ne.s32.totalorder %s675_s18, %s1088_s22  ;;  %s1179_s16 = smov [#allocation11]  }
  0x8c   : > { %840 = vmatmul.mubr.msk.f32.vlgmr.msra.gmra.mxu1 %vm409_vm1, %v399_v3  ;;  %853 = vmatprep.subr.mxu0 %v1177_v0  ;;  %v810_v18 = vld [vmem:[%s1487_s3] ss:$0 sm:$0xff]  ;;  %s1092_s9 = sshll.u32 %s1179_s16, 4  ;;  %s1093_s9 = int_to_ptr.vmem [resolvable:$false] %s1092_s9 }
  0x8d   : > { %842 = vmatprep.subr.mxu1 %v1177_v0  ;;  %854 = vmatpush3.msra.mxu0 %v499_v6  ;;  %v493_v16 = vmax.f32 %v492_v13, 0.0  ;;  %v815_v26 = vld [vmem:[%s1491_s7] ss:$0 sm:$0xff]  ;;  %p1090_p4 = pnand %p1089_p6, %p1530_p12  ;;  %s1094_s20 = scalar_lea.vmem %s1093_s9, 256 }
  0x8e   : > { %846 = vmatprep.mubr.msk.f32.mxu1 %vm1178_vm0, %v1177_v0  ;;  %855 = vmatprep.subr.mxu0 %v1177_v0  ;;  %p1095_p7 = scmp.lt.s32.totalorder %s675_s18, %s1093_s9  ;;  %p1096_p0 = scmp.lt.s32.totalorder %s1094_s20, %s1088_s22 }
  0x8f   : > { %856 = vmatpush3.msra.mxu0 %v498_v7  ;;  %843 = vmatpush3.msra.mxu1 %v503_v11  ;;  %p1091_p8 = pneg %p1090_p4 }
  0x90   : > { %857 = vmatprep.subr.mxu0 %v1177_v0  ;;  %844 = vmatprep.subr.mxu1 %v1177_v0  ;;  %p1097_p5 = por %p1096_p0, %p1095_p7 }
  0x91   : > { %858 = vmatpush3.msra.mxu0 %v497_v8  ;;  %845 = vmatpush3.msra.mxu1 %v502_v14 }
  0x92   : > { %859 = vmatprep.subr.mxu0 %v1177_v0  ;;  %847 = vmatmul.mubr.msk.f32.vlgmr.msra.gmra.mxu1 %vm409_vm1, %v493_v16  ;;  %p1098_p10 = pnand %p1097_p5, %p1091_p8 }
  0x93   : > { %860 = vmatpush3.msra.mxu0 %v496_v12 }
  0x94   : > { %861 = vmatprep.subr.mxu0 %v1177_v0 }
  0x95   : > { %862 = vmatpush3.msra.mxu0 %v495_v15 }
  0x96   : > { %863 = vmatprep.subr.mxu0 %v1177_v0 }
  0x97   : > { %864 = vmatpush3.msra.mxu0 %v494_v17 }
 0x14c   : > { %v479_v19 = vpop.f32.mrf.mxu1 }
 0x14d   : > { %v480_v20 = vadd.f32 %v810_v18, %v479_v19 }
 0x14e   : > { %v841_v21 = vpop.f32.mrf.mxu1 }
 0x14f   : > { %v483_v22 = vmax.f32 %v480_v20, 0.0 }
 0x151   : > { %866 = vmatmul.mubr.msk.f32.vlgmr.msra.gmra.mxu0 %vm577_vm2, %v483_v22 }
 0x152   : > { %v573_v23 = vpop.f32.mrf.mxu1 }
 0x154   : > { %v848_v24 = vpop.f32.mrf.mxu1 }
 0x211   : > { %v647_v25 = vpop.f32.mrf.mxu0 }
 0x212   : > { %v648_v27 = vadd.f32 %v647_v25, %v573_v23 }
 0x213   : > { %v867_v28 = vpop.f32.mrf.mxu0 }
 0x214   : > { %v658_v29 = vadd.f32 %v815_v26, %v648_v27 }
 0x216   : > { %659 = vst [vmem:[%s398_s10] sm:$0xff] %v658_v29 }
 0x217   : > { %1101 = shalt.err (!%p1098_p10)
}
 0x218   : > { %s1102_s1 = scalar_lea.hbm %s672_s29, 128  ;;  %s1106_s13 = scalar_lea.hbm %s1492_s8, 256 }
 0x219   : > { %p1103_p2 = scmp.ne.s32.totalorder %s672_s29, %s1102_s1  ;;  %p1107_p3 = scmp.lt.s32.totalorder %s672_s29, %s1492_s8 }
 0x21a   : > { %p1108_p1 = scmp.lt.s32.totalorder %s1106_s13, %s1102_s1 }
 0x21b   : > { %p1104_p9 = pnand %p1103_p2, %p1530_p12 }
 0x21c   : > { %p1109_p11 = por %p1108_p1, %p1107_p3 }
 0x21d   : > { %p1105_p13 = pneg %p1104_p9 }
 0x21f   : > { %p1110_p6 = pnand %p1109_p11, %p1105_p13 }
 0x221   : > { %1113 = shalt.err (!%p1110_p6)
}
 0x222   : > { %884 = dma.vmem_to_hbm [thread:$0]  (%p1530_p12), %s675_s18, 128, %s672_s29, %s661_s30  }
 0x223 PF: > { %s1531_s14 = sld [smem:[#allocation19_spill]]  ;;  %s686_s24 = sand.u32 1, %s1156_s27  }
 0x224   : > { %p1532_p4 = scmp.ne.s32.totalorder %s1510_s12, 0  ;;  %s687_s25 = scalar_lea.sflag [#allocation4], %s686_s24 }
 0x229   : > { %p1533_p8 = scmp.ge.s32.totalorder %s1531_s14, 2 }
 0x22b   : > { %p904_p7 = pnand %p1533_p8, %p1532_p4 }
 0x22d   : > { %p905_p0 = pneg %p904_p7 }
 0x22f   : > { %1151 = dma.done.wait (%p905_p0), %s687_s25, 128  }
 0x230   : > { %1153 = vsyncadd (%p905_p0), %s687_s25, 4294967168  ;;  %s1534_s30 = sld [smem:[#allocation20_spill]]  ;;  %s1537_s27 = smov %s1160_s28 }
 0x231   : > { %s1535_s10 = sld [smem:[#allocation18_spill]] }
 0x232   : > { %s1536_s29 = sld [smem:[#allocation21_spill]] }
 0x236   : > { %p23_p5 = scmp.ge.s32.totalorder %s1534_s30, 4  }
 0x237   : > { %s1538_s28 = smov %s1535_s10 }
 0x238   :  { %25 = sbr.rel (!%p23_p5) target bundleno = 9 (0x9), region = 120 }
 0x23d   :  { %692 = vsyncpa [#allocation3], 1 }
 0x23e   :  { %694 = vsyncpa [#allocation3 + $0x1], 1 }
 0x23f   :  { %695 = vsyncpa [#allocation6], 1 }
 0x240   :  { %696 = vsyncpa [#allocation10], 1 }
 0x241   :  { %697 = vsyncpa [#allocation4], 1 }
 0x242   :  { %699 = vsyncpa [#allocation4 + $0x1], 1 }

// kernel: tpu_custom_call.1
= control target key start
LH: loop header
LB: loop body
LE: loop exit
PB: predicated region body
PF: predicated region fallthrough
CT: control target
= control target key end

     0   :  { %s1484_s0 = inlined_call_operand.hbm [shape: f32[16,16], index: 0, kind: input, shape index: {}]   ;;  %s1485_s1 = inlined_call_operand.hbm [shape: f32[16,64], index: 1, kind: input, shape index: {}]   ;;  %s1486_s2 = inlined_call_operand.hbm [shape: f32[16,16], index: 2, kind: input, shape index: {}]   ;;  %s1487_s3 = inlined_call_operand.vmem [shape: f32[1,64], index: 3, kind: input, shape index: {}]   ;;  %s1488_s4 = inlined_call_operand.vmem [shape: f32[1,16], index: 4, kind: input, shape index: {}]   ;;  %s1489_s5 = inlined_call_operand.hbm [shape: f32[64,128], index: 5, kind: input, shape index: {}]   ;;  %s1490_s6 = inlined_call_operand.hbm [shape: f32[16,128], index: 6, kind: input, shape index: {}]   ;;  %s1491_s7 = inlined_call_operand.vmem [shape: f32[1,128], index: 7, kind: input, shape index: {}]   ;;  %s1492_s8 = inlined_call_operand.hbm [shape: f32[16,128], index: 8, kind: output, shape index: {}]  }
   0x1   :  { %1506 = sst [smem:[#allocation22_spill]] %s1485_s1 }
   0x2   :  { %13 = vsyncpa [#allocation3], 0 }
   0x3   :  { %15 = vsyncpa [#allocation3 + $0x1], 0 }
   0x4   :  { %16 = vsyncpa [#allocation6], 0 }
   0x5   :  { %17 = vsyncpa [#allocation10], 0 }
   0x6   :  { %18 = vsyncpa [#allocation4], 0 }
   0x7   :  { %20 = vsyncpa [#allocation4 + $0x1], 0  ;;  %s1225_s27 = smov 0   ;;  %s1227_s28 = smov 0  }
   0x8   :  { %s1229_s29 = smov 0   ;;  %s1231_s30 = smov 0  }
   0x9 LB: > { %1507 = sst [smem:[#allocation18_spill]] %s1164_s29  ;;  %s1246_s9 = sadd.s32 4294967295, %s1168_s30   ;;  %s1168_s30 = sphi %s1231_s30, %s1534_s30   ;;  %s1164_s29 = sphi %s1229_s29, %s1536_s29   ;;  %s1160_s28 = sphi %s1227_s28, %s1538_s28   ;;  %s1156_s27 = sphi %s1225_s27, %s1537_s27  }
   0xa   : > { %1508 = sst [smem:[#allocation19_spill]] %s1168_s30  ;;  %s793_s10 = sadd.s32 4294967294, %s1168_s30  }
   0xb   : > { %p46_p0 = scmp.ne.s32.totalorder %s1160_s28, %s1156_s27  ;;  %p1501_p1 = scmp.eq.s32.totalorder %s1246_s9, 0 }
   0xc   : > { %p222_p2 = scmp.eq.s32.totalorder %s1246_s9, 1  ;;  %p228_p3 = scmp.eq.s32.totalorder %s793_s10, 1 }
   0xd   : > { %p1255_p4 = por %p1501_p1, %p46_p0  ;;  %p794_p5 = scmp.ge.s32.totalorder %s1168_s30, 1 }
   0xe   : > { %p1260_p6 = por %p228_p3, %p46_p0  ;;  %p235_p7 = scmp.lt.s32.totalorder %s1168_s30, 3 }
   0xf   : > { %s1509_s11 = scalar_select %p1255_p4, 1, 0 }
  0x10   : > { %s1510_s12 = scalar_select %p1260_p6, 1, 0 }
  0x11   : > { %p1265_p8 = pnand %p794_p5, %p235_p7  ;;  %s1170_s14 = smov [#allocation5]  }
  0x12   : > { %s247_s15 = sshll.u32 %s1170_s14, 4  ;;  %s1279_s17 = sadd.s32 1, %s1168_s30   ;;  %s248_s15 = int_to_ptr.vmem [resolvable:$true] %s247_s15 }
  0x13   : > { %s1511_s13 = scalar_select %p1265_p8, 1, 0 }
  0x14   : > { %p886_p9 = pneg %p1265_p8  ;;  %1513 = sst [smem:[#allocation20_spill]] %s1279_s17 }
  0x15   : > { %s33_s18 = sadd.s32 1, %s1164_s29  ;;  %s30_s19 = ssub.s32 %s1168_s30, %s1279_s17 }
  0x16   : > { %p1274_p11 = pnand %p886_p9, %p1501_p1  ;;  %s965_s20 = scalar_lea.vmem %s248_s15, 256 }
  0x17   : > { %p966_p13 = scmp.ne.s32.totalorder %s248_s15, %s965_s20  ;;  %p973_p5 = scmp.lt.s32.totalorder %s248_s15, %s248_s15 }
  0x18   : > { %p1502_p12 = pneg %p1274_p11  ;;  %p974_p7 = scmp.lt.s32.totalorder %s965_s20, %s965_s20 }
  0x1a   : > { %p968_p0 = pnand %p966_p13, %p1502_p12  ;;  %p975_p9 = por %p974_p7, %p973_p5 }
  0x1c   : > { %p969_p3 = pneg %p968_p0 }
  0x1e   : > { %p976_p10 = pnand %p975_p9, %p969_p3 }
  0x20   : > { %979 = shalt.err (!%p976_p10)
}
  0x21   : > { %s1495_s21 = smov 128   ;;  %s1497_s22 = smov 8  }
  0x22   : > { %s1514_s1 = sld [smem:[#allocation22_spill]]  ;;  %p31_p10 = scmp.eq.s32.totalorder %s30_s19, 0 }
  0x23   : > { %p40_p13 = scmp.ne.s32.totalorder %s1164_s29, %s1160_s28  ;;  %p41_p0 = scmp.eq.s32.totalorder %s1168_s30, 0 }
  0x24   : > { %p910_p3 = scmp.lt.s32.totalorder %s1168_s30, 2  ;;  %s296_s10 = sand.u32 1, %s1168_s30  }
  0x25   : > { %s1302_s25 = scalar_select %p31_p10, %s1164_s29, %s33_s18  }
  0x26   : > { %p42_p5 = por %p41_p0, %p40_p13  ;;  %p1306_p7 = por %p222_p2, %p40_p13 }
  0x27   : > { %1515 = sst [smem:[#allocation21_spill]] %s1302_s25  ;;  %s298_s14 = sand.u32 1, %s1164_s29  }
  0x28   : > { %889 = dma.hbm_to_vmem [thread:$0]  (!%p1274_p11), %s1514_s1, 256, %s248_s15, [#allocation6], %s1495_s21, %s1495_s21, %s1497_s22  }
  0x29   : > { %s1516_s26 = scalar_select %p1306_p7, 1, 0 }
  0x2a   : > { %s1312_s20 = sshll.u32 %s298_s14, 3  ;;  %s800_s17 = sshll.u32 %s1168_s30, 7 }
  0x2b   : > { %s1318_s19 = scalar_lea.hbm %s1484_s0, %s800_s17  ;;  %s300_s18 = scalar_lea.vmem [#allocation2], %s1312_s20 }
  0x2c   : > { %s307_s24 = sshll.u32 %s300_s18, 4  ;;  %p1323_p2 = pnand %p910_p3, %p42_p5  ;;  %s1321_s24 = int_to_ptr.vmem [resolvable:$true] %s307_s24 }
  0x2d   : > { %s1330_s1 = scalar_lea.hbm %s1486_s2, %s800_s17  ;;  %s1332_s23 = scalar_lea.sflag [#allocation3], %s296_s10 }
  0x2e   : > { %s980_s15 = scalar_lea.hbm %s1318_s19, 128  ;;  %p982_p10 = pneg %p1323_p2 }
  0x2f   : > { %p981_p9 = scmp.ne.s32.totalorder %s1318_s19, %s980_s15  ;;  %s985_s29 = scalar_lea.hbm %s1484_s0, 256 }
  0x30   : > { %p986_p3 = scmp.lt.s32.totalorder %s1318_s19, %s1484_s0  ;;  %p987_p5 = scmp.lt.s32.totalorder %s985_s29, %s980_s15 }
  0x31   : > { %p983_p13 = pnand %p982_p10, %p981_p9 }
  0x32   : > { %p988_p1 = por %p987_p5, %p986_p3 }
  0x33   : > { %p984_p0 = pneg %p983_p13 }
  0x35   : > { %p989_p12 = pnand %p988_p1, %p984_p0 }
  0x37   : > { %992 = shalt.err (!%p989_p12)
}
  0x38   : > { %s993_s17 = scalar_lea.vmem %s1321_s24, 128  ;;  %s1173_s25 = smov [#allocation2]  }
  0x39   : > { %p994_p6 = scmp.ne.s32.totalorder %s1321_s24, %s993_s17  ;;  %s998_s10 = sshll.u32 %s1173_s25, 4  ;;  %s999_s10 = int_to_ptr.vmem [resolvable:$false] %s998_s10 }
  0x3a   : > { %s1000_s14 = scalar_lea.vmem %s999_s10, 256  ;;  %p1001_p7 = scmp.lt.s32.totalorder %s1321_s24, %s999_s10 }
  0x3b   : > { %p996_p9 = pnand %p994_p6, %p982_p10  ;;  %p1002_p4 = scmp.lt.s32.totalorder %s1000_s14, %s993_s17 }
  0x3d   : > { %p997_p13 = pneg %p996_p9  ;;  %p1003_p8 = por %p1002_p4, %p1001_p7 }
  0x3f   : > { %p1004_p3 = pnand %p1003_p8, %p997_p13 }
  0x41   : > { %1007 = shalt.err (!%p1004_p3)
}
  0x42   : > { %899 = dma.hbm_to_vmem [thread:$0]  (!%p1323_p2), %s1318_s19, 128, %s1321_s24, %s1332_s23  }
  0x43   : > { %s1174_s29 = smov [#allocation8]   ;;  %s1175_s15 = smov [#allocation9]  }
  0x44   : > { %s266_s30 = sshll.u32 %s1174_s29, 4  ;;  %s279_s18 = sshll.u32 %s1175_s15, 4  ;;  %s267_s30 = int_to_ptr.vmem [resolvable:$true] %s266_s30  ;;  %s280_s18 = int_to_ptr.vmem [resolvable:$true] %s279_s18 }
  0x45   : > { %s1019_s22 = scalar_lea.vmem %s267_s30, 1024  ;;  %p1518_p6 = pneg %p1274_p11 }
  0x46   : > { %p1020_p1 = scmp.ne.s32.totalorder %s267_s30, %s1019_s22  ;;  %p1027_p8 = scmp.lt.s32.totalorder %s267_s30, %s267_s30 }
  0x47   : > { %p1028_p7 = scmp.lt.s32.totalorder %s1019_s22, %s1019_s22 }
  0x48   : > { %p1022_p12 = pnand %p1020_p1, %p1518_p6 }
  0x49   : > { %p1029_p0 = por %p1028_p7, %p1027_p8 }
  0x4a   : > { %p1023_p4 = pneg %p1022_p12 }
  0x4c   : > { %p1030_p5 = pnand %p1029_p0, %p1023_p4 }
  0x4e   : > { %1033 = shalt.err (!%p1030_p5)
}
  0x4f   : > { %s1519_s17 = smov 8   ;;  %s1520_s19 = smov 128  }
  0x50   : > { %892 = dma.hbm_to_vmem [thread:$0]  (!%p1274_p11), %s1489_s5, 1024, %s267_s30, [#allocation6], %s1520_s19, %s1520_s19, %s1519_s17  }
  0x51   : > { %s318_s10 = scalar_lea.vmem [#allocation7], %s1312_s20  ;;  %s1045_s29 = scalar_lea.vmem %s280_s18, 256 }
  0x52   : > { %s325_s14 = sshll.u32 %s318_s10, 4  ;;  %p1046_p9 = scmp.ne.s32.totalorder %s280_s18, %s1045_s29  ;;  %s326_s14 = int_to_ptr.vmem [resolvable:$true] %s325_s14 }
  0x53   : > { %p1521_p13 = pmov %p1518_p6  ;;  %p1053_p6 = scmp.lt.s32.totalorder %s280_s18, %s280_s18 }
  0x54   : > { %p1054_p12 = scmp.lt.s32.totalorder %s1045_s29, %s1045_s29 }
  0x55   : > { %p1048_p3 = pnand %p1046_p9, %p1521_p13 }
  0x56   : > { %p1055_p4 = por %p1054_p12, %p1053_p6 }
  0x57   : > { %p1049_p1 = pneg %p1048_p3 }
  0x59   : > { %p1056_p8 = pnand %p1055_p4, %p1049_p1 }
  0x5b   : > { %1059 = shalt.err (!%p1056_p8)
}
  0x5c   : > { %895 = dma.hbm_to_vmem [thread:$0]  (!%p1274_p11), %s1490_s6, 256, %s280_s18, [#allocation10], %s1520_s19, %s1520_s19, %s1519_s17  }
  0x5d   : > { %s1060_s20 = scalar_lea.hbm %s1330_s1, 128  ;;  %s1065_s24 = scalar_lea.hbm %s1486_s2, 256 }
  0x5e   : > { %p1061_p7 = scmp.ne.s32.totalorder %s1330_s1, %s1060_s20  ;;  %p1066_p9 = scmp.lt.s32.totalorder %s1330_s1, %s1486_s2 }
  0x5f   : > { %p1067_p13 = scmp.lt.s32.totalorder %s1065_s24, %s1060_s20 }
  0x60   : > { %p1063_p0 = pnand %p1061_p7, %p982_p10 }
  0x61   : > { %p1068_p3 = por %p1067_p13, %p1066_p9 }
  0x62   : > { %p1064_p5 = pneg %p1063_p0 }
  0x64   : > { %p1069_p1 = pnand %p1068_p3, %p1064_p5 }
  0x66   : > { %1072 = shalt.err (!%p1069_p1)
}
  0x67   : > { %s1073_s18 = scalar_lea.vmem %s326_s14, 128  ;;  %s1176_s17 = smov [#allocation7]  }
  0x68   : > { %p1074_p11 = scmp.ne.s32.totalorder %s326_s14, %s1073_s18  ;;  %s1078_s19 = sshll.u32 %s1176_s17, 4  ;;  %s1079_s19 = int_to_ptr.vmem [resolvable:$false] %s1078_s19 }
  0x69   : > { %s1080_s29 = scalar_lea.vmem %s1079_s19, 256  ;;  %p1081_p4 = scmp.lt.s32.totalorder %s326_s14, %s1079_s19 }
  0x6a   : > { %p1076_p6 = pnand %p1074_p11, %p982_p10  ;;  %p1082_p8 = scmp.lt.s32.totalorder %s1080_s29, %s1073_s18 }
  0x6c   : > { %p1077_p12 = pneg %p1076_p6  ;;  %p1083_p7 = por %p1082_p8, %p1081_p4 }
  0x6e   : > { %p1084_p0 = pnand %p1083_p7, %p1077_p12 }
  0x70   : > { %1087 = shalt.err (!%p1084_p0)
}
  0x71   : > { %902 = dma.hbm_to_vmem [thread:$0]  (!%p1323_p2), %s1330_s1, 128, %s326_s14, %s1332_s23  }
  0x72   : > { %p1522_p5 = scmp.ne.s32.totalorder %s1511_s13, 0 }
  0x73   : > { %s336_s30 = sand.u32 (!%p1522_p5), 1, %s1246_s9   ;;  %s338_s15 = sand.u32 (!%p1522_p5), 1, %s1160_s28  }
  0x74   : > { %334 = sbr.rel (%p1522_p5) target bundleno = 547 (0x223), region = 52  ;;  %s1407_s20 = sshll.u32 (!%p1522_p5), %s338_s15, 3 }
  0x75   : > { %s337_s22 = scalar_lea.sflag (!%p1522_p5), [#allocation3], %s336_s30  ;;  %s340_s16 = scalar_lea.vmem (!%p1522_p5), [#allocation2], %s1407_s20 }
  0x76   : > { %p1523_p10 = scmp.ne.s32.totalorder (!%p1522_p5), %s1509_s11, 0 }
  0x79   : > { %1131 = dma.done.wait (%p1523_p10), %s337_s22, 128  }
  0x7a   : > { %1133 = vsyncadd (%p1523_p10), %s337_s22, 4294967168  ;;  %p1524_p2 = scmp.eq.s32.totalorder %s1246_s9, 0 }
  0x7c   : > { %1135 = dma.done.wait (%p1524_p2), [#allocation6], 256   ;;  %p1525_p9 = pmov %p1524_p2 }
  0x7d   : > { %s353_s1 = scalar_lea.vmem [#allocation7], %s1407_s20 }
  0x7e   : > { %1137 = vsyncadd (%p1525_p9), [#allocation6], 4294967040 }
  0x7f   : > { %1139 = dma.done.wait (%p1523_p10), %s337_s22, 128  }
  0x80   : > { %1141 = vsyncadd (%p1523_p10), %s337_s22, 4294967168  ;;  %p1526_p13 = pmov %p1524_p2 }
  0x81   : > { %p1527_p3 = pmov %p1524_p2 }
  0x82   : > { %1143 = dma.done.wait (%p1526_p13), [#allocation6], 1024  }
  0x83   : > { %1145 = vsyncadd (%p1527_p3), [#allocation6], 4294966272  ;;  %p1528_p1 = pmov %p1524_p2 }
  0x85   : > { %1147 = dma.done.wait (%p1528_p1), [#allocation10], 256   ;;  %p1529_p11 = pmov %p1528_p1 }
  0x86   : > { %v1177_v0 = vmov 0.0   ;;  %vm1178_vm0 = vmmov 0   ;;  %v401_v1 = vld [vmem:[#allocation5 + $0x8] sm:$0xff]  ;;  %v400_v2 = vld [vmem:[#allocation5] sm:$0xff]  ;;  %v399_v3 = vld [vmem:[%s340_s16] sm:$0xff]  ;;  %vm409_vm1 = vcmask 130048  }
  0x87   : > { %1149 = vsyncadd (%p1529_p11), [#allocation10], 4294967040  ;;  %835 = vmatprep.subr.mxu1 %v1177_v0  ;;  %839 = vmatprep.mubr.msk.f32.mxu1 %vm1178_vm0, %v1177_v0  ;;  %v501_v4 = vld [vmem:[#allocation8 + $0x38] sm:$0xff]  ;;  %v500_v5 = vld [vmem:[#allocation8 + $0x30] sm:$0xff]  ;;  %vm577_vm2 = vcmask 523264   ;;  %s817_s25 = sshll.u32 %s1246_s9, 7 }
  0x88   : > { %849 = vmatprep.subr.mxu0 %v1177_v0  ;;  %865 = vmatprep.mubr.msk.f32.mxu0 %vm1178_vm0, %v1177_v0  ;;  %v499_v6 = vld [vmem:[#allocation8 + $0x28] sm:$0xff]  ;;  %v498_v7 = vld [vmem:[#allocation8 + $0x20] sm:$0xff]  ;;  %v497_v8 = vld [vmem:[#allocation8 + $0x18] sm:$0xff]  ;;  %s398_s10 = scalar_lea.vmem [#allocation11], %s1407_s20  ;;  %s672_s29 = scalar_lea.hbm %s1492_s8, %s817_s25 }
  0x89   : > { %836 = vmatpush3.msra.mxu1 %v401_v1  ;;  %850 = vmatpush3.msra.mxu0 %v501_v4  ;;  %v484_v9 = vld [vmem:[%s353_s1] sm:$0xff]  ;;  %v503_v11 = vld [vmem:[#allocation9 + $0x8] sm:$0xff]  ;;  %v502_v14 = vld [vmem:[#allocation9] sm:$0xff]  ;;  %s674_s18 = sshll.u32 %s398_s10, 4  ;;  %s661_s30 = scalar_lea.sflag [#allocation4], %s338_s15  ;;  %s675_s18 = int_to_ptr.vmem [resolvable:$true] %s674_s18 }
  0x8a   : > { %837 = vmatprep.subr.mxu1 %v1177_v0  ;;  %851 = vmatprep.subr.mxu0 %v1177_v0  ;;  %v812_v10 = vld [vmem:[%s1488_s4] ss:$0 sm:$0xff]  ;;  %v495_v15 = vld [vmem:[#allocation8 + $0x8] sm:$0xff]  ;;  %v494_v17 = vld [vmem:[#allocation8] sm:$0xff]  ;;  %s1088_s22 = scalar_lea.vmem %s675_s18, 128  ;;  %p1530_p12 = scmp.ne.s32.totalorder %s1516_s26, 0 }
  0x8b   : > { %838 = vmatpush3.msra.mxu1 %v400_v2  ;;  %852 = vmatpush3.msra.mxu0 %v500_v5  ;;  %v496_v12 = vld [vmem:[#allocation8 + $0x10] sm:$0xff]  ;;  %v492_v13 = vadd.f32 %v812_v10, %v484_v9  ;;  %p1089_p6 = scmp.ne.s32.totalorder %s675_s18, %s1088_s22  ;;  %s1179_s16 = smov [#allocation11]  }
  0x8c   : > { %840 = vmatmul.mubr.msk.f32.vlgmr.msra.gmra.mxu1 %vm409_vm1, %v399_v3  ;;  %853 = vmatprep.subr.mxu0 %v1177_v0  ;;  %v810_v18 = vld [vmem:[%s1487_s3] ss:$0 sm:$0xff]  ;;  %s1092_s9 = sshll.u32 %s1179_s16, 4  ;;  %s1093_s9 = int_to_ptr.vmem [resolvable:$false] %s1092_s9 }
  0x8d   : > { %842 = vmatprep.subr.mxu1 %v1177_v0  ;;  %854 = vmatpush3.msra.mxu0 %v499_v6  ;;  %v493_v16 = vmax.f32 %v492_v13, 0.0  ;;  %v815_v26 = vld [vmem:[%s1491_s7] ss:$0 sm:$0xff]  ;;  %p1090_p4 = pnand %p1089_p6, %p1530_p12  ;;  %s1094_s20 = scalar_lea.vmem %s1093_s9, 256 }
  0x8e   : > { %846 = vmatprep.mubr.msk.f32.mxu1 %vm1178_vm0, %v1177_v0  ;;  %855 = vmatprep.subr.mxu0 %v1177_v0  ;;  %p1095_p7 = scmp.lt.s32.totalorder %s675_s18, %s1093_s9  ;;  %p1096_p0 = scmp.lt.s32.totalorder %s1094_s20, %s1088_s22 }
  0x8f   : > { %856 = vmatpush3.msra.mxu0 %v498_v7  ;;  %843 = vmatpush3.msra.mxu1 %v503_v11  ;;  %p1091_p8 = pneg %p1090_p4 }
  0x90   : > { %857 = vmatprep.subr.mxu0 %v1177_v0  ;;  %844 = vmatprep.subr.mxu1 %v1177_v0  ;;  %p1097_p5 = por %p1096_p0, %p1095_p7 }
  0x91   : > { %858 = vmatpush3.msra.mxu0 %v497_v8  ;;  %845 = vmatpush3.msra.mxu1 %v502_v14 }
  0x92   : > { %859 = vmatprep.subr.mxu0 %v1177_v0  ;;  %847 = vmatmul.mubr.msk.f32.vlgmr.msra.gmra.mxu1 %vm409_vm1, %v493_v16  ;;  %p1098_p10 = pnand %p1097_p5, %p1091_p8 }
  0x93   : > { %860 = vmatpush3.msra.mxu0 %v496_v12 }
  0x94   : > { %861 = vmatprep.subr.mxu0 %v1177_v0 }
  0x95   : > { %862 = vmatpush3.msra.mxu0 %v495_v15 }
  0x96   : > { %863 = vmatprep.subr.mxu0 %v1177_v0 }
  0x97   : > { %864 = vmatpush3.msra.mxu0 %v494_v17 }
 0x14c   : > { %v479_v19 = vpop.f32.mrf.mxu1 }
 0x14d   : > { %v480_v20 = vadd.f32 %v810_v18, %v479_v19 }
 0x14e   : > { %v841_v21 = vpop.f32.mrf.mxu1 }
 0x14f   : > { %v483_v22 = vmax.f32 %v480_v20, 0.0 }
 0x151   : > { %866 = vmatmul.mubr.msk.f32.vlgmr.msra.gmra.mxu0 %vm577_vm2, %v483_v22 }
 0x152   : > { %v573_v23 = vpop.f32.mrf.mxu1 }
 0x154   : > { %v848_v24 = vpop.f32.mrf.mxu1 }
 0x211   : > { %v647_v25 = vpop.f32.mrf.mxu0 }
 0x212   : > { %v648_v27 = vadd.f32 %v647_v25, %v573_v23 }
 0x213   : > { %v867_v28 = vpop.f32.mrf.mxu0 }
 0x214   : > { %v658_v29 = vadd.f32 %v815_v26, %v648_v27 }
 0x216   : > { %659 = vst [vmem:[%s398_s10] sm:$0xff] %v658_v29 }
 0x217   : > { %1101 = shalt.err (!%p1098_p10)
}
 0x218   : > { %s1102_s1 = scalar_lea.hbm %s672_s29, 128  ;;  %s1106_s13 = scalar_lea.hbm %s1492_s8, 256 }
 0x219   : > { %p1103_p2 = scmp.ne.s32.totalorder %s672_s29, %s1102_s1  ;;  %p1107_p3 = scmp.lt.s32.totalorder %s672_s29, %s1492_s8 }
 0x21a   : > { %p1108_p1 = scmp.lt.s32.totalorder %s1106_s13, %s1102_s1 }
 0x21b   : > { %p1104_p9 = pnand %p1103_p2, %p1530_p12 }
 0x21c   : > { %p1109_p11 = por %p1108_p1, %p1107_p3 }
 0x21d   : > { %p1105_p13 = pneg %p1104_p9 }
 0x21f   : > { %p1110_p6 = pnand %p1109_p11, %p1105_p13 }
 0x221   : > { %1113 = shalt.err (!%p1110_p6)
}
 0x222   : > { %884 = dma.vmem_to_hbm [thread:$0]  (%p1530_p12), %s675_s18, 128, %s672_s29, %s661_s30  }
 0x223 PF: > { %s1531_s14 = sld [smem:[#allocation19_spill]]  ;;  %s686_s24 = sand.u32 1, %s1156_s27  }
 0x224   : > { %p1532_p4 = scmp.ne.s32.totalorder %s1510_s12, 0  ;;  %s687_s25 = scalar_lea.sflag [#allocation4], %s686_s24 }
 0x229   : > { %p1533_p8 = scmp.ge.s32.totalorder %s1531_s14, 2 }
 0x22b   : > { %p904_p7 = pnand %p1533_p8, %p1532_p4 }
 0x22d   : > { %p905_p0 = pneg %p904_p7 }
 0x22f   : > { %1151 = dma.done.wait (%p905_p0), %s687_s25, 128  }
 0x230   : > { %1153 = vsyncadd (%p905_p0), %s687_s25, 4294967168  ;;  %s1534_s30 = sld [smem:[#allocation20_spill]]  ;;  %s1537_s27 = smov %s1160_s28 }
 0x231   : > { %s1535_s10 = sld [smem:[#allocation18_spill]] }
 0x232   : > { %s1536_s29 = sld [smem:[#allocation21_spill]] }
 0x236   : > { %p23_p5 = scmp.ge.s32.totalorder %s1534_s30, 4  }
 0x237   : > { %s1538_s28 = smov %s1535_s10 }
 0x238   :  { %25 = sbr.rel (!%p23_p5) target bundleno = 9 (0x9), region = 120 }
 0x23d   :  { %692 = vsyncpa [#allocation3], 1 }
 0x23e   :  { %694 = vsyncpa [#allocation3 + $0x1], 1 }
 0x23f   :  { %695 = vsyncpa [#allocation6], 1 }
 0x240   :  { %696 = vsyncpa [#allocation10], 1 }
 0x241   :  { %697 = vsyncpa [#allocation4], 1 }
 0x242   :  { %699 = vsyncpa [#allocation4 + $0x1], 1 }

</bundles_post_ra>
